<compile_context>
chip_gen: v6e
topology: v6e:2x2x1
jax: 0.10.0
libtpu: 0.0.40
codegen_flags: <defaults>
</compile_context>

<pallas_src>
import functools

import jax
import jax.numpy as jnp
from jax.experimental import pallas as pl
from jax.experimental.pallas import tpu as pltpu


# ----------------------------------------------------------------------------
# Tiling helpers
# ----------------------------------------------------------------------------
_ROW_TILE_PREF = 512     # sublane-axis tile preference (multiple of 8)
_LANE_TILE_PREF = 512    # lane-axis tile preference  (multiple of 128)


def _pick_tile(total, preferred, granule):
    """Largest multiple of `granule` that divides `total` and is <= preferred;
    falls back to the full extent (always a legal block shape)."""
    cap = min(preferred, total)
    t = (cap // granule) * granule
    while t >= granule:
        if total % t == 0:
            return t
        t -= granule
    return total


def _vmem_limit(tile_bytes):
    # tile in + tile out, double-buffered, plus slack; clamp to sane range.
    return int(min(max(4 * tile_bytes + (4 << 20), 16 << 20), 64 << 20))


# ----------------------------------------------------------------------------
# Kernel 1: squeeze  (spatial mean -> FC1 -> ReLU -> FC2(gate) / FC2(bias))
# ----------------------------------------------------------------------------
def _squeeze_kernel(state_ref, w1_ref, b1_ref, w2g_ref, b2g_ref, w2b_ref,
                    b2b_ref, z_ref, bias_ref, acc_ref, *, inv_spatial):
    """state_ref: (B, C, S_TILE) tile of flattened spatial
       weights   : full (in, out) blocks, gate/bias halves pre-split
       z_ref/bias_ref: (B, C) f32 outputs (written on last reduction step)
       acc_ref   : (B, C) f32 VMEM accumulator"""
    s = pl.program_id(0)

    @pl.when(s == 0)
    def _():
        acc_ref[...] = jnp.zeros_like(acc_ref)

    # Partial spatial sum of this tile (f32 accumulate).
    acc_ref[...] += jnp.sum(state_ref[...].astype(jnp.float32), axis=-1)

    @pl.when(s == pl.num_programs(0) - 1)
    def _():
        pooled = acc_ref[...] * inv_spatial                       # (B, C)
        h = jnp.dot(pooled, w1_ref[...].astype(jnp.float32),
                    preferred_element_type=jnp.float32)
        h = jnp.maximum(h + b1_ref[...].astype(jnp.float32), 0.0)  # (B, C//r)
        zlog = jnp.dot(h, w2g_ref[...].astype(jnp.float32),
                       preferred_element_type=jnp.float32)
        zlog = zlog + b2g_ref[...].astype(jnp.float32)
        bias = jnp.dot(h, w2b_ref[...].astype(jnp.float32),
                       preferred_element_type=jnp.float32)
        bias = bias + b2b_ref[...].astype(jnp.float32)
        z_ref[...] = jax.nn.sigmoid(zlog).astype(z_ref.dtype)
        bias_ref[...] = bias.astype(bias_ref.dtype)


def _squeeze(state_nchw, w1, b1, w2g, b2g, w2b, b2b):
    B, C, Hs, Ws = state_nchw.shape
    S = Hs * Ws
    st = state_nchw.reshape(B, C, S)                   # metadata-only reshape
    s_tile = _pick_tile(S, _LANE_TILE_PREF, 128)
    grid = (S // s_tile,)

    def full(shape):
        return pl.BlockSpec(shape, lambda s, _shape=shape: (0,) * len(_shape))

    kern = functools.partial(_squeeze_kernel, inv_spatial=1.0 / float(S))
    tile_bytes = B * C * s_tile * state_nchw.dtype.itemsize

    z, bias = pl.pallas_call(
        kern,
        out_shape=(jax.ShapeDtypeStruct((B, C), jnp.float32),
                   jax.ShapeDtypeStruct((B, C), jnp.float32)),
        grid=grid,
        in_specs=[pl.BlockSpec((B, C, s_tile), lambda s: (0, 0, s)),
                  full(w1.shape), full(b1.shape),
                  full(w2g.shape), full(b2g.shape),
                  full(w2b.shape), full(b2b.shape)],
        out_specs=(full((B, C)), full((B, C))),
        scratch_shapes=[pltpu.VMEM((B, C), jnp.float32)],
        compiler_params=pltpu.CompilerParams(
            dimension_semantics=("arbitrary",),        # reduction axis
            vmem_limit_bytes=_vmem_limit(tile_bytes)),
    )(st, w1, b1, w2g, b2g, w2b, b2b)
    return z, bias


# ----------------------------------------------------------------------------
# Kernel 2: excite  (out = input_ * z + b), gridded & lane-dense
# ----------------------------------------------------------------------------
def _excite_kernel(x_ref, z_ref, b_ref, o_ref):
    """x_ref/o_ref: (ROW_TILE, LANE_TILE); z_ref/b_ref: (ROW_TILE, 1) f32.
    One (b, c) channel per row -> gate/bias broadcast is a cheap lane splat."""
    x = x_ref[...].astype(jnp.float32)
    o_ref[...] = (x * z_ref[...] + b_ref[...]).astype(o_ref.dtype)


def _excite_fold2_kernel(x_ref, z_ref, b_ref, o_ref, *, span):
    """Channel-pair-folded variant: each row holds 2 channels of `span`
    spatial elements each (lane width 2*span, a multiple of 128).
    z_ref/b_ref: (ROW_TILE, 2) f32.  Gate selection via lane iota compare
    (pure VPU work, no cross-lane relayout)."""
    x = x_ref[...].astype(jnp.float32)                 # (RT, 2*span)
    zb = z_ref[...]
    bb = b_ref[...]
    lane = jax.lax.broadcasted_iota(jnp.int32, x.shape, 1)
    hi = lane >= span
    z = jnp.where(hi, zb[:, 1:2], zb[:, 0:1])
    b = jnp.where(hi, bb[:, 1:2], bb[:, 0:1])
    o_ref[...] = (x * z + b).astype(o_ref.dtype)


def _excite(x_nchw, z, bias, *, in_place=False):
    B, C, H, W = x_nchw.shape
    S = H * W
    dtype = x_nchw.dtype
    # Fold adjacent channel pairs into one lane row when that makes the
    # store width a multiple of 128 (e.g. 8x8 boards: 64 -> 128 lanes).
    fold2 = (S % 128 != 0) and (C % 2 == 0) and ((2 * S) % 128 == 0)

    if fold2:
        rows, lanes = (B * C) // 2, 2 * S
        x2 = x_nchw.reshape(rows, lanes)               # contiguous reshape
        z2 = z.reshape(rows, 2)
        b2 = bias.reshape(rows, 2)
        row_tile = _pick_tile(rows, _ROW_TILE_PREF, 8)
        grid = (rows // row_tile,)
        kern = functools.partial(_excite_fold2_kernel, span=S)
        x_spec = pl.BlockSpec((row_tile, lanes), lambda r: (r, 0))
        g_spec = pl.BlockSpec((row_tile, 2), lambda r: (r, 0))
        semantics = ("parallel",)
        tile_bytes = row_tile * lanes * dtype.itemsize
    else:
        rows, lanes = B * C, S
        x2 = x_nchw.reshape(rows, lanes)               # contiguous reshape
        z2 = z.reshape(rows, 1)
        b2 = bias.reshape(rows, 1)
        row_tile = _pick_tile(rows, _ROW_TILE_PREF, 8)
        lane_tile = _pick_tile(lanes, _LANE_TILE_PREF, 128)
        grid = (rows // row_tile, lanes // lane_tile)
        kern = _excite_kernel
        x_spec = pl.BlockSpec((row_tile, lane_tile), lambda r, s: (r, s))
        g_spec = pl.BlockSpec((row_tile, 1), lambda r, s: (r, 0))
        semantics = ("parallel", "parallel")
        tile_bytes = row_tile * lane_tile * dtype.itemsize

    kwargs = {}
    if in_place:
        kwargs["input_output_aliases"] = {0: 0}        # gate input_ in place

    out = pl.pallas_call(
        kern,
        out_shape=jax.ShapeDtypeStruct(x2.shape, dtype),
        grid=grid,
        in_specs=[x_spec, g_spec, g_spec],
        out_specs=x_spec,
        compiler_params=pltpu.CompilerParams(
            dimension_semantics=semantics,
            vmem_limit_bytes=_vmem_limit(tile_bytes)),
        **kwargs,
    )(x2, z2, b2)
    return out.reshape(B, C, H, W)


# ----------------------------------------------------------------------------
# Wrapper
# ----------------------------------------------------------------------------
def squeeze_and_excite(state_nchw, input_nchw, w1, b1, w2, b2, *,
                       in_place=False):
    """state_nchw: (B, C, Hs, Ws); input_nchw: (B, C, Hi, Wi); spatial sizes
    may differ (gate/bias broadcast over input_'s spatial).  Output dtype
    follows input_."""
    B, C, _, _ = state_nchw.shape
    Bi, Ci, _, _ = input_nchw.shape
    assert (B, C) == (Bi, Ci), "state and input_ must share (B, C)"

    # Split the second Linear into gate / bias halves at trace time (free):
    # removes the non-128-aligned wb[:, :C] / wb[:, C:] slice from the kernel.
    w2g, w2b = w2[:, :C], w2[:, C:]
    b2g, b2b = b2[:, :C], b2[:, C:]

    z, bias = _squeeze(state_nchw, w1, b1, w2g, b2g, w2b, b2b)   # (B, C) f32
    return _excite(input_nchw, z, bias, in_place=in_place)


@jax.jit
def forward(params, state, input_):
    return squeeze_and_excite(state, input_,
                              params["w1"], params["b1"],
                              params["w2"], params["b2"])


# ----------------------------------------------------------------------------
# Parameters (weights stored as (in, out) == transposed nn.Linear layout)
# ----------------------------------------------------------------------------
def init_params(key, channels, squeeze_rate):
    cs = int(channels // squeeze_rate)

    def dense(k, shape, fan_in):
        return (jax.random.normal(k, shape, jnp.float32) /
                jnp.sqrt(jnp.float32(fan_in)))

    k1, k2, k3, k4 = jax.random.split(key, 4)
    return {
        "w1": dense(k1, (channels, cs), channels),
        "b1": dense(k2, (1, cs), channels),
        "w2": dense(k3, (cs, 2 * channels), cs),
        "b2": dense(k4, (1, 2 * channels), cs),
    }


# ----------------------------------------------------------------------------
# Pure-JAX reference (correctness check)
# ----------------------------------------------------------------------------
def ref_forward(params, state, input_):
    hi = jax.lax.Precision.HIGHEST
    C = state.shape[1]
    pooled = jnp.mean(state.astype(jnp.float32), axis=(2, 3))    # (B, C)
    h = jnp.maximum(jnp.dot(pooled, params["w1"], precision=hi)
                    + params["b1"], 0.0)
    wb = jnp.dot(h, params["w2"], precision=hi) + params["b2"]   # (B, 2C)
    z = jax.nn.sigmoid(wb[:, :C])[:, :, None, None]
    b = wb[:, C:][:, :, None, None]
    return input_.astype(jnp.float32) * z + b


# ----------------------------------------------------------------------------
if __name__ == "__main__":
    SQUEEZE_RATE = 4
    key = jax.random.PRNGKey(0)
    kp, ks, ki, ks2, ki2 = jax.random.split(key, 5)

    # --- Config 1: rnad-style 8x8 board, C=32 (channel-pair lane-dense path)
    B, C, H, W = 2, 32, 8, 8
    params = init_params(kp, C, SQUEEZE_RATE)
    state = jax.random.normal(ks, (B, C, H, W), jnp.float32)     # NCHW
    input_ = jax.random.normal(ki, (B, C, H, W), jnp.float32)

    out = jax.block_until_ready(forward(params, state, input_))
    ref = ref_forward(params, state, input_)
    assert out.shape == (B, C, H, W) and out.dtype == input_.dtype
    err1 = jnp.max(jnp.abs(out - ref))
    assert jnp.allclose(out, ref, atol=1e-4, rtol=1e-4), f"cfg1 diff {err1}"

    # --- Config 2: larger spatial (multi-tile grids, plain lane-dense path) -
    H2, W2 = 32, 32
    state2 = jax.random.normal(ks2, (B, C, H2, W2), jnp.float32)
    input2 = jax.random.normal(ki2, (B, C, H2, W2), jnp.float32)
    out2 = jax.block_until_ready(forward(params, state2, input2))
    ref2 = ref_forward(params, state2, input2)
    err2 = jnp.max(jnp.abs(out2 - ref2))
    assert jnp.allclose(out2, ref2, atol=1e-4, rtol=1e-4), f"cfg2 diff {err2}"

    # --- Config 3: native bf16 I/O (f32 only on squeeze / in-register) ------
    state_bf = state.astype(jnp.bfloat16)
    input_bf = input_.astype(jnp.bfloat16)
    out3 = jax.block_until_ready(forward(params, state_bf, input_bf))
    assert out3.dtype == jnp.bfloat16
    ref3 = ref_forward(params, state_bf, input_bf)
    assert jnp.allclose(out3.astype(jnp.float32), ref3, atol=6e-2, rtol=6e-2)

    print("KERNEL_OK")
</pallas_src>

<mosaic_0001>
module attributes {stable_mosaic.version = 11 : i64} {
  func.func @_squeeze_kernel(%arg0: i32, %arg1: memref<2x32x64xf32, #tpu.memory_space<vmem>>, %arg2: memref<32x8xf32, #tpu.memory_space<vmem>>, %arg3: memref<1x8xf32, #tpu.memory_space<vmem>>, %arg4: memref<8x32xf32, #tpu.memory_space<vmem>>, %arg5: memref<1x32xf32, #tpu.memory_space<vmem>>, %arg6: memref<8x32xf32, #tpu.memory_space<vmem>>, %arg7: memref<1x32xf32, #tpu.memory_space<vmem>>, %arg8: memref<2x32xf32, #tpu.memory_space<vmem>>, %arg9: memref<2x32xf32, #tpu.memory_space<vmem>>, %arg10: memref<2x32xf32, #tpu.memory_space<vmem>>) attributes {dimension_semantics = [#tpu.dimension_semantics<arbitrary>], iteration_bounds = array<i64: 1>, scalar_prefetch = 0 : i64, scratch_operands = 1 : i64, tpu.core_type = #tpu.core_type<tc>, window_params = [{transform_indices = @transform_0, window_bounds = array<i64: 2, 32, 64>}, {pipeline_mode = #tpu.pipeline_mode<synchronous>, transform_indices = @transform_1, window_bounds = array<i64: 32, 8>}, {pipeline_mode = #tpu.pipeline_mode<synchronous>, transform_indices = @transform_2, window_bounds = array<i64: 1, 8>}, {pipeline_mode = #tpu.pipeline_mode<synchronous>, transform_indices = @transform_3, window_bounds = array<i64: 8, 32>}, {pipeline_mode = #tpu.pipeline_mode<synchronous>, transform_indices = @transform_4, window_bounds = array<i64: 1, 32>}, {pipeline_mode = #tpu.pipeline_mode<synchronous>, transform_indices = @transform_5, window_bounds = array<i64: 8, 32>}, {pipeline_mode = #tpu.pipeline_mode<synchronous>, transform_indices = @transform_6, window_bounds = array<i64: 1, 32>}, {pipeline_mode = #tpu.pipeline_mode<synchronous>, transform_indices = @transform_7, window_bounds = array<i64: 2, 32>}, {pipeline_mode = #tpu.pipeline_mode<synchronous>, transform_indices = @transform_8, window_bounds = array<i64: 2, 32>}]} {
    %c0_i32 = arith.constant 0 : i32
    %0 = arith.cmpi eq, %arg0, %c0_i32 : i32
    %1 = arith.extui %0 : i1 to i32
    %c0_i32_0 = arith.constant 0 : i32
    %2 = arith.cmpi ne, %1, %c0_i32_0 : i32
    scf.if %2 {
      %cst_9 = arith.constant 0.000000e+00 : f32
      %11 = vector.broadcast %cst_9 : f32 to vector<2x32xf32>
      %c0_10 = arith.constant 0 : index
      %c0_11 = arith.constant 0 : index
      %12 = vector.load %arg10[%c0_10, %c0_11] : memref<2x32xf32, #tpu.memory_space<vmem>>, vector<2x32xf32>
      tpu.vector_store %arg10[%c0_10, %c0_11], %11 {strides = array<i32>} : memref<2x32xf32, #tpu.memory_space<vmem>>, vector<2x32xf32>,
    } else {
    }
    %c0 = arith.constant 0 : index
    %c0_1 = arith.constant 0 : index
    %3 = vector.load %arg10[%c0, %c0_1] : memref<2x32xf32, #tpu.memory_space<vmem>>, vector<2x32xf32>
    %c0_2 = arith.constant 0 : index
    %c0_3 = arith.constant 0 : index
    %c0_4 = arith.constant 0 : index
    %4 = vector.load %arg1[%c0_2, %c0_3, %c0_4] : memref<2x32x64xf32, #tpu.memory_space<vmem>>, vector<2x32x64xf32>
    %cst = arith.constant dense<0.000000e+00> : vector<2x32xf32>
    %5 = vector.multi_reduction <add>, %4, %cst [2] : vector<2x32x64xf32> to vector<2x32xf32>
    %6 = arith.addf %3, %5 : vector<2x32xf32>
    %c0_5 = arith.constant 0 : index
    %c0_6 = arith.constant 0 : index
    %7 = vector.load %arg10[%c0_5, %c0_6] : memref<2x32xf32, #tpu.memory_space<vmem>>, vector<2x32xf32>
    tpu.vector_store %arg10[%c0_5, %c0_6], %6 {strides = array<i32>} : memref<2x32xf32, #tpu.memory_space<vmem>>, vector<2x32xf32>,
    %c0_i32_7 = arith.constant 0 : i32
    %8 = arith.cmpi eq, %arg0, %c0_i32_7 : i32
    %9 = arith.extui %8 : i1 to i32
    %c0_i32_8 = arith.constant 0 : i32
    %10 = arith.cmpi ne, %9, %c0_i32_8 : i32
    scf.if %10 {
      %c0_9 = arith.constant 0 : index
      %c0_10 = arith.constant 0 : index
      %11 = vector.load %arg10[%c0_9, %c0_10] : memref<2x32xf32, #tpu.memory_space<vmem>>, vector<2x32xf32>
      %cst_11 = arith.constant 1.562500e-02 : f32
      %12 = vector.broadcast %cst_11 : f32 to vector<2x32xf32>
      %13 = arith.mulf %11, %12 : vector<2x32xf32>
      %c0_12 = arith.constant 0 : index
      %c0_13 = arith.constant 0 : index
      %14 = vector.load %arg2[%c0_12, %c0_13] : memref<32x8xf32, #tpu.memory_space<vmem>>, vector<32x8xf32>
      %cst_14 = arith.constant dense<0.000000e+00> : vector<2x8xf32>
      %15 = tpu.matmul %13, %14, %cst_14 {dimension_numbers = #tpu.dot_dimension_numbers<[1], [0], [0], [1], [0, 0, 1, 1], [], []>} : vector<2x32xf32>, vector<32x8xf32>, vector<2x8xf32> -> vector<2x8xf32>
      %c0_15 = arith.constant 0 : index
      %c0_16 = arith.constant 0 : index
      %16 = vector.load %arg3[%c0_15, %c0_16] : memref<1x8xf32, #tpu.memory_space<vmem>>, vector<1x8xf32>
      %17 = vector.broadcast %16 : vector<1x8xf32> to vector<2x8xf32>
      %18 = arith.addf %15, %17 : vector<2x8xf32>
      %cst_17 = arith.constant 0.000000e+00 : f32
      %19 = vector.broadcast %cst_17 : f32 to vector<2x8xf32>
      %20 = arith.maximumf %18, %19 : vector<2x8xf32>
      %c0_18 = arith.constant 0 : index
      %c0_19 = arith.constant 0 : index
      %21 = vector.load %arg4[%c0_18, %c0_19] : memref<8x32xf32, #tpu.memory_space<vmem>>, vector<8x32xf32>
      %cst_20 = arith.constant dense<0.000000e+00> : vector<2x32xf32>
      %22 = tpu.matmul %20, %21, %cst_20 {dimension_numbers = #tpu.dot_dimension_numbers<[1], [0], [0], [1], [0, 0, 1, 1], [], []>} : vector<2x8xf32>, vector<8x32xf32>, vector<2x32xf32> -> vector<2x32xf32>
      %c0_21 = arith.constant 0 : index
      %c0_22 = arith.constant 0 : index
      %23 = vector.load %arg5[%c0_21, %c0_22] : memref<1x32xf32, #tpu.memory_space<vmem>>, vector<1x32xf32>
      %24 = vector.broadcast %23 : vector<1x32xf32> to vector<2x32xf32>
      %25 = arith.addf %22, %24 : vector<2x32xf32>
      %c0_23 = arith.constant 0 : index
      %c0_24 = arith.constant 0 : index
      %26 = vector.load %arg6[%c0_23, %c0_24] : memref<8x32xf32, #tpu.memory_space<vmem>>, vector<8x32xf32>
      %cst_25 = arith.constant dense<0.000000e+00> : vector<2x32xf32>
      %27 = tpu.matmul %20, %26, %cst_25 {dimension_numbers = #tpu.dot_dimension_numbers<[1], [0], [0], [1], [0, 0, 1, 1], [], []>} : vector<2x8xf32>, vector<8x32xf32>, vector<2x32xf32> -> vector<2x32xf32>
      %c0_26 = arith.constant 0 : index
      %c0_27 = arith.constant 0 : index
      %28 = vector.load %arg7[%c0_26, %c0_27] : memref<1x32xf32, #tpu.memory_space<vmem>>, vector<1x32xf32>
      %29 = vector.broadcast %28 : vector<1x32xf32> to vector<2x32xf32>
      %30 = arith.addf %27, %29 : vector<2x32xf32>
      %31 = arith.negf %25 : vector<2x32xf32>
      %32 = math.exp %31 : vector<2x32xf32>
      %cst_28 = arith.constant 1.000000e+00 : f32
      %33 = vector.broadcast %cst_28 : f32 to vector<2x32xf32>
      %34 = arith.addf %33, %32 : vector<2x32xf32>
      %35 = arith.divf %33, %34 : vector<2x32xf32>
      %c0_29 = arith.constant 0 : index
      %c0_30 = arith.constant 0 : index
      %36 = vector.load %arg8[%c0_29, %c0_30] : memref<2x32xf32, #tpu.memory_space<vmem>>, vector<2x32xf32>
      tpu.vector_store %arg8[%c0_29, %c0_30], %35 {strides = array<i32>} : memref<2x32xf32, #tpu.memory_space<vmem>>, vector<2x32xf32>,
      %c0_31 = arith.constant 0 : index
      %c0_32 = arith.constant 0 : index
      %37 = vector.load %arg9[%c0_31, %c0_32] : memref<2x32xf32, #tpu.memory_space<vmem>>, vector<2x32xf32>
      tpu.vector_store %arg9[%c0_31, %c0_32], %30 {strides = array<i32>} : memref<2x32xf32, #tpu.memory_space<vmem>>, vector<2x32xf32>,
    } else {
    }
    return
  }
  func.func @transform_0(%arg0: i32) -> (i32, i32, i32) {
    %c0_i32 = arith.constant 0 : i32
    %c0_i32_0 = arith.constant 0 : i32
    %c0_i32_1 = arith.constant 0 : i32
    return %c0_i32, %c0_i32_0, %arg0 : i32, i32, i32
  }
  func.func @transform_1(%arg0: i32) -> (i32, i32) {
    %c0_i32 = arith.constant 0 : i32
    %c0_i32_0 = arith.constant 0 : i32
    %c0_i32_1 = arith.constant 0 : i32
    return %c0_i32, %c0_i32_0 : i32, i32
  }
  func.func @transform_2(%arg0: i32) -> (i32, i32) {
    %c0_i32 = arith.constant 0 : i32
    %c0_i32_0 = arith.constant 0 : i32
    %c0_i32_1 = arith.constant 0 : i32
    return %c0_i32, %c0_i32_0 : i32, i32
  }
  func.func @transform_3(%arg0: i32) -> (i32, i32) {
    %c0_i32 = arith.constant 0 : i32
    %c0_i32_0 = arith.constant 0 : i32
    %c0_i32_1 = arith.constant 0 : i32
    return %c0_i32, %c0_i32_0 : i32, i32
  }
  func.func @transform_4(%arg0: i32) -> (i32, i32) {
    %c0_i32 = arith.constant 0 : i32
    %c0_i32_0 = arith.constant 0 : i32
    %c0_i32_1 = arith.constant 0 : i32
    return %c0_i32, %c0_i32_0 : i32, i32
  }
  func.func @transform_5(%arg0: i32) -> (i32, i32) {
    %c0_i32 = arith.constant 0 : i32
    %c0_i32_0 = arith.constant 0 : i32
    %c0_i32_1 = arith.constant 0 : i32
    return %c0_i32, %c0_i32_0 : i32, i32
  }
  func.func @transform_6(%arg0: i32) -> (i32, i32) {
    %c0_i32 = arith.constant 0 : i32
    %c0_i32_0 = arith.constant 0 : i32
    %c0_i32_1 = arith.constant 0 : i32
    return %c0_i32, %c0_i32_0 : i32, i32
  }
  func.func @transform_7(%arg0: i32) -> (i32, i32) {
    %c0_i32 = arith.constant 0 : i32
    %c0_i32_0 = arith.constant 0 : i32
    %c0_i32_1 = arith.constant 0 : i32
    return %c0_i32, %c0_i32_0 : i32, i32
  }
  func.func @transform_8(%arg0: i32) -> (i32, i32) {
    %c0_i32 = arith.constant 0 : i32
    %c0_i32_0 = arith.constant 0 : i32
    %c0_i32_1 = arith.constant 0 : i32
    return %c0_i32, %c0_i32_0 : i32, i32
  }
}

module attributes {stable_mosaic.version = 11 : i64} {
  func.func @_excite_fold2_kernel(%arg0: i32, %arg1: memref<32x128xf32, #tpu.memory_space<vmem>>, %arg2: memref<32x2xf32, #tpu.memory_space<vmem>>, %arg3: memref<32x2xf32, #tpu.memory_space<vmem>>, %arg4: memref<32x128xf32, #tpu.memory_space<vmem>>) attributes {dimension_semantics = [#tpu.dimension_semantics<parallel>], iteration_bounds = array<i64: 1>, scalar_prefetch = 0 : i64, scratch_operands = 0 : i64, tpu.core_type = #tpu.core_type<tc>, window_params = [{transform_indices = @transform_0, window_bounds = array<i64: 32, 128>}, {transform_indices = @transform_1, window_bounds = array<i64: 32, 2>}, {transform_indices = @transform_2, window_bounds = array<i64: 32, 2>}, {transform_indices = @transform_3, window_bounds = array<i64: 32, 128>}]} {
    %c0 = arith.constant 0 : index
    %c0_0 = arith.constant 0 : index
    %0 = vector.load %arg1[%c0, %c0_0] : memref<32x128xf32, #tpu.memory_space<vmem>>, vector<32x128xf32>
    %c0_1 = arith.constant 0 : index
    %c0_2 = arith.constant 0 : index
    %1 = vector.load %arg2[%c0_1, %c0_2] : memref<32x2xf32, #tpu.memory_space<vmem>>, vector<32x2xf32>
    %c0_3 = arith.constant 0 : index
    %c0_4 = arith.constant 0 : index
    %2 = vector.load %arg3[%c0_3, %c0_4] : memref<32x2xf32, #tpu.memory_space<vmem>>, vector<32x2xf32>
    %3 = tpu.iota {dimensions = array<i32: 1>} : vector<32x128xi32>
    %c64_i32 = arith.constant 64 : i32
    %4 = vector.broadcast %c64_i32 : i32 to vector<32x128xi32>
    %5 = arith.cmpi sge, %3, %4 : vector<32x128xi32>
    %6 = vector.extract_strided_slice %1 {offsets = [0, 1], sizes = [32, 1], strides = [1, 1]} : vector<32x2xf32> to vector<32x1xf32>
    %7 = vector.extract_strided_slice %1 {offsets = [0, 0], sizes = [32, 1], strides = [1, 1]} : vector<32x2xf32> to vector<32x1xf32>
    %8 = vector.shape_cast %6 : vector<32x1xf32> to vector<32x1xf32>
    %9 = vector.broadcast %8 : vector<32x1xf32> to vector<32x128xf32>
    %10 = vector.shape_cast %7 : vector<32x1xf32> to vector<32x1xf32>
    %11 = vector.broadcast %10 : vector<32x1xf32> to vector<32x128xf32>
    %12 = arith.select %5, %9, %11 : vector<32x128xi1>, vector<32x128xf32>
    %13 = vector.extract_strided_slice %2 {offsets = [0, 1], sizes = [32, 1], strides = [1, 1]} : vector<32x2xf32> to vector<32x1xf32>
    %14 = vector.extract_strided_slice %2 {offsets = [0, 0], sizes = [32, 1], strides = [1, 1]} : vector<32x2xf32> to vector<32x1xf32>
    %15 = vector.shape_cast %13 : vector<32x1xf32> to vector<32x1xf32>
    %16 = vector.broadcast %15 : vector<32x1xf32> to vector<32x128xf32>
    %17 = vector.shape_cast %14 : vector<32x1xf32> to vector<32x1xf32>
    %18 = vector.broadcast %17 : vector<32x1xf32> to vector<32x128xf32>
    %19 = arith.select %5, %16, %18 : vector<32x128xi1>, vector<32x128xf32>
    %20 = arith.mulf %0, %12 : vector<32x128xf32>
    %21 = arith.addf %20, %19 : vector<32x128xf32>
    %c0_5 = arith.constant 0 : index
    %c0_6 = arith.constant 0 : index
    %22 = vector.load %arg4[%c0_5, %c0_6] : memref<32x128xf32, #tpu.memory_space<vmem>>, vector<32x128xf32>
    tpu.vector_store %arg4[%c0_5, %c0_6], %21 {strides = array<i32>} : memref<32x128xf32, #tpu.memory_space<vmem>>, vector<32x128xf32>,
    return
  }
  func.func @transform_0(%arg0: i32) -> (i32, i32) {
    %c0_i32 = arith.constant 0 : i32
    %c0_i32_0 = arith.constant 0 : i32
    return %arg0, %c0_i32 : i32, i32
  }
  func.func @transform_1(%arg0: i32) -> (i32, i32) {
    %c0_i32 = arith.constant 0 : i32
    %c0_i32_0 = arith.constant 0 : i32
    return %arg0, %c0_i32 : i32, i32
  }
  func.func @transform_2(%arg0: i32) -> (i32, i32) {
    %c0_i32 = arith.constant 0 : i32
    %c0_i32_0 = arith.constant 0 : i32
    return %arg0, %c0_i32 : i32, i32
  }
  func.func @transform_3(%arg0: i32) -> (i32, i32) {
    %c0_i32 = arith.constant 0 : i32
    %c0_i32_0 = arith.constant 0 : i32
    return %arg0, %c0_i32 : i32, i32
  }
}

</mosaic_0001>

<bundles_post_ra>
// kernel: forward.3
= control target key start
LH: loop header
LB: loop body
LE: loop exit
PB: predicated region body
PF: predicated region fallthrough
CT: control target
= control target key end

     0   :  { %v133_v0 = vmov 1   ;;  %v134_v6 = vmov 0   ;;  %v26_v15 = vlaneseq  ;;  %s211_s1 = inlined_call_operand.vmem [shape: f32[32,2], index: 1, kind: input, shape index: {}]   ;;  %s212_s2 = inlined_call_operand.vmem [shape: f32[32,2], index: 2, kind: input, shape index: {}]   ;;  %s213_s0 = inlined_call_operand.vmem [shape: f32[32,128], index: 0, kind: input, shape index: {}]   ;;  %s214_s3 = inlined_call_operand.vmem [shape: f32[32,128], index: 3, kind: output, shape index: {}]  }
   0x1   :  { %128 = vset.pattern.permute.xlu1 %v133_v0  ;;  %127 = vset.pattern.permute.xlu0 %v133_v0  ;;  %v20_v1 = vld [vmem:[%s211_s1 + $0x10] sm:$0xff]  ;;  %v18_v2 = vld [vmem:[%s211_s1] sm:$0xff]  ;;  %v21_v3 = vld [vmem:[%s211_s1 + $0x18] sm:$0xff] }
   0x2   :  { %41 = vperm.xlu1 %128, %v20_v1   ;;  %31 = vperm.xlu0 %127, %v18_v2   ;;  %v19_v4 = vld [vmem:[%s211_s1 + $0x8] sm:$0xff]  ;;  %v22_v7 = vld [vmem:[%s212_s2] sm:$0xff]  ;;  %v24_v8 = vld [vmem:[%s212_s2 + $0x10] sm:$0xff]  ;;  %v27_v17 = vand.u32 127, %v26_v15 }
   0x3   :  { %v23_v5 = vld [vmem:[%s212_s2 + $0x8] sm:$0xff]  ;;  %v25_v9 = vld [vmem:[%s212_s2 + $0x18] sm:$0xff]  ;;  %v14_v21 = vld [vmem:[%s213_s0] sm:$0xff] }
   0x4   :  { %vm28_vm0 = vcmp.ge.s32.totalorder %v27_v17, 64  ;;  %v17_v28 = vld [vmem:[%s213_s0 + $0x18] sm:$0xff]  ;;  %v15_v35 = vld [vmem:[%s213_s0 + $0x8] sm:$0xff]  ;;  %v16_v40 = vld [vmem:[%s213_s0 + $0x10] sm:$0xff] }
   0x6   :  { %46 = vperm.xlu1 %128, %v21_v3   ;;  %36 = vperm.xlu0 %127, %v19_v4  }
   0xa   :  { %129 = vset.pattern.permute.xlu1 %v134_v6  ;;  %76 = vperm.xlu0 %127, %v23_v5  }
   0xb   :  { %54 = vperm.xlu1 %129, %v19_v4  }
   0xe   :  { %131 = vset.pattern.permute.xlu0 %v134_v6 }
   0xf   :  { %58 = vperm.xlu1 %129, %v20_v1   ;;  %50 = vperm.xlu0 %131, %v18_v2  }
  0x13   :  { %130 = vset.pattern.permute.xlu1 %v133_v0  ;;  %62 = vperm.xlu0 %131, %v21_v3  }
  0x14   :  { %71 = vperm.xlu1 %130, %v22_v7  }
  0x17   :  { %90 = vperm.xlu0 %131, %v22_v7  }
  0x18   :  { %81 = vperm.xlu1 %130, %v24_v8  }
  0x1b   :  { %102 = vperm.xlu0 %131, %v25_v9  }
  0x1c   :  { %86 = vperm.xlu1 %130, %v25_v9  }
  0x20   :  { %132 = vset.pattern.permute.xlu1 %v134_v6 }
  0x21   :  { %94 = vperm.xlu1 %132, %v23_v5  }
  0x25   :  { %98 = vperm.xlu1 %132, %v24_v8  }
  0x7d   :  { %v42_v10 = vpop.permute.xlu1 %41  ;;  %v32_v11 = vpop.permute.xlu0 %31 }
  0x81   :  { %v47_v12 = vpop.permute.xlu1 %46  ;;  %v37_v13 = vpop.permute.xlu0 %36 }
  0x85   :  { %v77_v14 = vpop.permute.xlu0 %76 }
  0x86   :  { %v55_v16 = vpop.permute.xlu1 %54 }
  0x87   :  { %v66_v36 = vsel %vm28_vm0, %v37_v13, %v55_v16 }
  0x88   :  { %v110_v38 = vmul.f32 %v66_v36, %v15_v35 }
  0x8a   :  { %v59_v18 = vpop.permute.xlu1 %58  ;;  %v51_v19 = vpop.permute.xlu0 %50 }
  0x8b   :  { %v65_v22 = vsel %vm28_vm0, %v32_v11, %v51_v19  ;;  %v67_v41 = vsel %vm28_vm0, %v42_v10, %v59_v18 }
  0x8c   :  { %v109_v24 = vmul.f32 %v65_v22, %v14_v21  ;;  %v111_v44 = vmul.f32 %v67_v41, %v16_v40 }
  0x8e   :  { %v63_v20 = vpop.permute.xlu0 %62 }
  0x8f   :  { %v72_v23 = vpop.permute.xlu1 %71  ;;  %v68_v29 = vsel %vm28_vm0, %v47_v12, %v63_v20 }
  0x90   :  { %v112_v32 = vmul.f32 %v68_v29, %v17_v28 }
  0x92   :  { %v91_v25 = vpop.permute.xlu0 %90 }
  0x93   :  { %v105_v26 = vsel %vm28_vm0, %v72_v23, %v91_v25  ;;  %v82_v27 = vpop.permute.xlu1 %81 }
  0x94   :  { %v113_v30 = vadd.f32 %v109_v24, %v105_v26 }
  0x96   :  { %117 = vst [vmem:[%s214_s3] sm:$0xff] %v113_v30  ;;  %v103_v31 = vpop.permute.xlu0 %102 }
  0x97   :  { %v87_v33 = vpop.permute.xlu1 %86 }
  0x98   :  { %v108_v34 = vsel %vm28_vm0, %v87_v33, %v103_v31 }
  0x99   :  { %v116_v37 = vadd.f32 %v112_v32, %v108_v34 }
  0x9b   :  { %120 = vst [vmem:[%s214_s3 + $0x18] sm:$0xff] %v116_v37 }
  0x9c   :  { %v95_v39 = vpop.permute.xlu1 %94 }
  0x9d   :  { %v106_v42 = vsel %vm28_vm0, %v77_v14, %v95_v39 }
  0x9e   :  { %v114_v43 = vadd.f32 %v110_v38, %v106_v42 }
  0xa0   :  { %118 = vst [vmem:[%s214_s3 + $0x8] sm:$0xff] %v114_v43  ;;  %v99_v45 = vpop.permute.xlu1 %98 }
  0xa1   :  { %v107_v46 = vsel %vm28_vm0, %v82_v27, %v99_v45 }
  0xa2   :  { %v115_v47 = vadd.f32 %v111_v44, %v107_v46 }
  0xa4   :  { %119 = vst [vmem:[%s214_s3 + $0x10] sm:$0xff] %v115_v47 }

// kernel: forward.2
= control target key start
LH: loop header
LB: loop body
LE: loop exit
PB: predicated region body
PF: predicated region fallthrough
CT: control target
= control target key end

     0   :  { %vm43_vm0 = vcmask 523264   ;;  %vm32_vm1 = vcmask 254976   ;;  %v438_v16 = vmov 0.0   ;;  %vm439_vm2 = vmmov 0   ;;  %s567_s0 = inlined_call_operand.vmem [shape: f32[2,32,64], index: 0, kind: input, shape index: {}]   ;;  %s568_s1 = inlined_call_operand.vmem [shape: f32[32,8], index: 1, kind: input, shape index: {}]   ;;  %s569_s3 = inlined_call_operand.vmem [shape: f32[8,32], index: 3, kind: input, shape index: {}]   ;;  %s570_s2 = inlined_call_operand.vmem [shape: f32[1,8], index: 2, kind: input, shape index: {}]   ;;  %s571_s5 = inlined_call_operand.vmem [shape: f32[8,32], index: 5, kind: input, shape index: {}]   ;;  %s572_s4 = inlined_call_operand.vmem [shape: f32[1,32], index: 4, kind: input, shape index: {}]   ;;  %s573_s6 = inlined_call_operand.vmem [shape: f32[1,32], index: 6, kind: input, shape index: {}]   ;;  %s574_s8 = inlined_call_operand.vmem [shape: f32[2,32], index: 8, kind: output, shape index: {1}]   ;;  %s575_s7 = inlined_call_operand.vmem [shape: f32[2,32], index: 7, kind: output, shape index: {0}]  }
   0x1   :  { %v39_v0 = vld [vmem:[%s567_s0 + $0x20] sm:$0xff]  ;;  %v40_v2 = vld [vmem:[%s567_s0 + $0x28] sm:$0xff]  ;;  %v41_v8 = vld [vmem:[%s567_s0 + $0x30] sm:$0xff]  ;;  %33 = vst.msk [vmem:[#allocation2] sm:$0x3] %vm32_vm1, %v438_v16  ;;  %411 = vmatprep.subr.mxu0 %v438_v16  ;;  %422 = vmatprep.subr.mxu1 %v438_v16  ;;  %v76_v21 = vlaneseq  ;;  %vm87_vm3 = vcmask 130112  }
   0x2   :  { %v35_v1 = vld [vmem:[%s567_s0] sm:$0xff]  ;;  %v56_v3 = vsel %vm43_vm0, %v39_v0, 0.0  ;;  %v36_v5 = vld [vmem:[%s567_s0 + $0x8] sm:$0xff]  ;;  %v59_v6 = vsel %vm43_vm0, %v40_v2, 0.0  ;;  %v37_v9 = vld [vmem:[%s567_s0 + $0x10] sm:$0xff]  ;;  %v62_v10 = vsel %vm43_vm0, %v41_v8, 0.0  ;;  %419 = vmatprep.mubr.msk.f32.mxu0 %vm439_vm2, %v438_v16  ;;  %424 = vmatprep.mubr.msk.f32.mxu1 %vm439_vm2, %v438_v16 }
   0x3   :  { %v44_v4 = vsel %vm43_vm0, %v35_v1, 0.0  ;;  %57 = vadd.xlane.f32.xlu1 %v56_v3  ;;  %v47_v7 = vsel %vm43_vm0, %v36_v5, 0.0  ;;  %v50_v11 = vsel %vm43_vm0, %v37_v9, 0.0  ;;  %v42_v12 = vld [vmem:[%s567_s0 + $0x38] sm:$0xff]  ;;  %v135_v18 = vld [vmem:[%s568_s1 + $0x10] sm:$0xff]  ;;  %v134_v19 = vld [vmem:[%s568_s1 + $0x8] sm:$0xff] }
   0x4   :  { %45 = vadd.xlane.f32.xlu0 %v44_v4  ;;  %v38_v13 = vld [vmem:[%s567_s0 + $0x18] sm:$0xff]  ;;  %v65_v14 = vsel %vm43_vm0, %v42_v12, 0.0  ;;  %v133_v20 = vld [vmem:[%s568_s1] sm:$0xff]  ;;  %v77_v22 = vand.u32 127, %v76_v21  ;;  %v79_v27 = vshrl.u32 %v76_v21, 7  ;;  %vm94_vm4 = vcmask 195712  }
   0x5   :  { %v53_v15 = vsel %vm43_vm0, %v38_v13, 0.0  ;;  %v136_v17 = vld [vmem:[%s568_s1 + $0x18] sm:$0xff]  ;;  %vm101_vm5 = vcmask 261312   ;;  %vm122_vm6 = vcmask 1041409   ;;  %vm144_vm7 = vcmask 261120   ;;  %v219_v58 = vld [vmem:[%s569_s3] sm:$0xff] }
   0x6   :  { %412 = vmatpush3.msra.mxu0 %v136_v17  ;;  %v82_v25 = vadd.s32 4294967288, %v77_v22  ;;  %v89_v26 = vadd.s32 4294967280, %v77_v22  ;;  %v96_v31 = vadd.s32 4294967272, %v77_v22  ;;  %v80_v33 = vsub.s32 %v77_v22, %v79_v27  ;;  %423 = vmatpush3.msra.mxu1 %v219_v58  ;;  %v395_v59 = vld [vmem:[%s570_s2] ss:$0 sm:$0xff] }
   0x7   :  { %60 = vadd.xlane.f32.xlu1 %v59_v6  ;;  %413 = vmatprep.subr.mxu0 %v438_v16  ;;  %vm227_vm8 = vcmask 64512   ;;  %v301_v0 = vld [vmem:[%s571_s5] sm:$0xff] }
   0x8   :  { %48 = vadd.xlane.f32.xlu0 %v47_v7  ;;  %414 = vmatpush3.msra.mxu0 %v135_v18  ;;  %v85_v30 = vsub.s32 %v82_v25, %v79_v27  ;;  %v92_v32 = vsub.s32 %v89_v26, %v79_v27  ;;  %v99_v38 = vsub.s32 %v96_v31, %v79_v27  ;;  %v34_v51 = vld [vmem:[#allocation2] sm:$0x3] }
   0x9   :  { %415 = vmatprep.subr.mxu0 %v438_v16  ;;  %427 = vmatprep.subr.mxu1 %v438_v16  ;;  %v397_v1 = vld [vmem:[%s572_s4] ss:$0 sm:$0xff] }
   0xa   :  { %416 = vmatpush3.msra.mxu0 %v134_v19  ;;  %v399_v5 = vld [vmem:[%s573_s6] ss:$0 sm:$0xff] }
   0xb   :  { %63 = vadd.xlane.f32.xlu1 %v62_v10  ;;  %417 = vmatprep.subr.mxu0 %v438_v16 }
   0xc   :  { %51 = vadd.xlane.f32.xlu0 %v50_v11  ;;  %418 = vmatpush3.msra.mxu0 %v133_v20 }
   0xf   :  { %66 = vadd.xlane.f32.xlu1 %v65_v14 }
  0x10   :  { %54 = vadd.xlane.f32.xlu0 %v53_v15 }
  0x8c   :  { %v58_v23 = vpop.xlane.xlu1 %57 }
  0x8d   :  { %v46_v24 = vpop.xlane.xlu0 %45  ;;  %v106_v41 = vrot.slane %v58_v23, %v80_v33 }
  0x8e   :  { %v81_v42 = vrot.slane %v46_v24, %v80_v33 }
  0x90   :  { %v61_v28 = vpop.xlane.xlu1 %60 }
  0x91   :  { %v49_v29 = vpop.xlane.xlu0 %48  ;;  %v110_v36 = vrot.slane %v61_v28, %v85_v30 }
  0x92   :  { %v86_v37 = vrot.slane %v49_v29, %v85_v30 }
  0x93   :  { %v111_v45 = vsel %vm87_vm3, %v110_v36, %v106_v41 }
  0x94   :  { %v64_v34 = vpop.xlane.xlu1 %63  ;;  %v88_v46 = vsel %vm87_vm3, %v86_v37, %v81_v42 }
  0x95   :  { %v52_v35 = vpop.xlane.xlu0 %51  ;;  %v115_v39 = vrot.slane %v64_v34, %v92_v32 }
  0x96   :  { %v93_v40 = vrot.slane %v52_v35, %v92_v32 }
  0x97   :  { %v116_v49 = vsel %vm94_vm4, %v115_v39, %v111_v45 }
  0x98   :  { %v67_v43 = vpop.xlane.xlu1 %66  ;;  %v95_v50 = vsel %vm94_vm4, %v93_v40, %v88_v46 }
  0x99   :  { %v55_v44 = vpop.xlane.xlu0 %54  ;;  %v120_v47 = vrot.slane %v67_v43, %v99_v38 }
  0x9a   :  { %v100_v48 = vrot.slane %v55_v44, %v99_v38 }
  0x9b   :  { %v121_v52 = vsel %vm101_vm5, %v120_v47, %v116_v49 }
  0x9c   :  { %v102_v53 = vsel %vm101_vm5, %v100_v48, %v95_v50 }
  0x9d   :  { %v123_v54 = vsel %vm122_vm6, %v121_v52, %v102_v53 }
  0x9e   :  { %v125_v55 = vadd.f32 %v123_v54, %v34_v51 }
  0xa0   :  { %127 = vst.msk [vmem:[#allocation2] sm:$0x3] %vm32_vm1, %v125_v55 }
  0xa7   :  { %v131_v56 = vld [vmem:[#allocation2] sm:$0x3] }
  0xa8   :  { %v132_v57 = vmul.f32 0.015625, %v131_v56 }
  0xaa   :  { %420 = vmatmul.mubr.msk.f32.vlgmr.msra.gmra.mxu0 %vm144_vm7, %v132_v57 }
 0x16a   :  { %v214_v60 = vpop.f32.mrf.mxu0 }
 0x16b   :  { %v215_v61 = vadd.f32 %v395_v59, %v214_v60 }
 0x16c   :  { %v421_v62 = vpop.f32.mrf.mxu0 }
 0x16d   :  { %v218_v63 = vmax.f32 %v215_v61, 0.0 }
 0x16f   :  { %425 = vmatmul.mubr.msk.f32.vlgmr.msra.gmra.mxu1 %vm227_vm8, %v218_v63 }
 0x170   :  { %428 = vmatpush3.msra.mxu1 %v301_v0  ;;  %429 = vmatprep.mubr.msk.f32.mxu1 %vm439_vm2, %v438_v16 }
 0x173   :  { %430 = vmatmul.mubr.msk.f32.vlgmr.msra.gmra.mxu1 %vm227_vm8, %v218_v63 }
 0x22f   :  { %v297_v2 = vpop.f32.mrf.mxu1 }
 0x230   :  { %v298_v3 = vadd.f32 %v397_v1, %v297_v2 }
 0x231   :  { %v426_v4 = vpop.f32.mrf.mxu1 }
 0x232   :  { %v401_v6 = vmul.f32 -1.442695, %v298_v3 }
 0x233   :  { %v375_v7 = vpop.f32.mrf.mxu1 }
 0x234   :  { %434 = vpow2.f32 %v401_v6  ;;  %v376_v8 = vadd.f32 %v399_v5, %v375_v7 }
 0x235   :  { %v431_v9 = vpop.f32.mrf.mxu1 }
 0x236   :  { %386 = vst.msk [vmem:[%s574_s8] sm:$0x3] %vm32_vm1, %v376_v8 }
 0x241   :  { %v435_v10 = vpop.eup %434 }
 0x242   :  { %v382_v11 = vadd.f32 1.0, %v435_v10 }
 0x244   :  { %436 = vrcp.f32 %v382_v11 }
 0x251   :  { %v437_v12 = vpop.eup %436 }
 0x252   :  { %385 = vst.msk [vmem:[%s575_s7] sm:$0x3] %vm32_vm1, %v437_v12 }

</bundles_post_ra>
